<compile_context>
chip_gen: v5e
topology: v5e:2x2
jax: 0.10.0
libtpu: 0.0.40
codegen_flags: <defaults>
</compile_context>

<pallas_src>
import jax
import jax.numpy as jnp
from jax.experimental import pallas as pl
from jax.experimental.pallas import tpu as pltpu


def resblock_kernel(x_ref, w1_ref, b1_ref, w2_ref, b2_ref, o_ref):
    # x_ref:  (1, Cin, L)   one batch element, native Conv1d layout
    # w1_ref: (3, Ch, Cin)  conv1 taps: k=0 -> x[l-1], k=1 -> x[l], k=2 -> x[l+1]
    # b1_ref: (Ch, 1)
    # w2_ref: (Cin, Ch)     1x1 conv
    # b2_ref: (Cin, 1)
    # o_ref:  (1, Cin, L)
    x = x_ref[0]                                    # (Cin, L)
    h = jnp.maximum(x, 0.0)                         # ReLU before conv1

    L = x.shape[1]
    lane = jax.lax.broadcasted_iota(jnp.int32, x.shape, 1)   # lane index along L

    # Shifted copies via XLU roll + boundary mask (zero padding at l=0 / l=L-1).
    h_prev = jnp.where(lane == 0, 0.0, pltpu.roll(h, shift=1, axis=1))       # x[l-1]
    h_next = jnp.where(lane == L - 1, 0.0, pltpu.roll(h, shift=L - 1, axis=1))  # x[l+1]

    y1 = (
        jnp.dot(w1_ref[0], h_prev, preferred_element_type=jnp.float32)
        + jnp.dot(w1_ref[1], h, preferred_element_type=jnp.float32)
        + jnp.dot(w1_ref[2], h_next, preferred_element_type=jnp.float32)
        + b1_ref[...]                                # (Ch, L)
    )

    h2 = jnp.maximum(y1, 0.0)                        # ReLU before conv2

    y2 = jnp.dot(w2_ref[...], h2, preferred_element_type=jnp.float32) + b2_ref[...]  # (Cin, L)

    o_ref[0] = (y2 + x).astype(o_ref.dtype)          # residual add (un-ReLU'd x)


def resblock_forward(x_ncl, w1_pt, b1, w2_pt, b2):
    """Forward pass of ResBlock.

    x_ncl : (N, Cin, L)  float32, PyTorch Conv1d layout
    w1_pt : (Ch, Cin, 3) PyTorch Conv1d(in_channel, channel, 3) weight
    b1    : (Ch,)
    w2_pt : (Cin, Ch, 1) PyTorch Conv1d(channel, in_channel, 1) weight
    b2    : (Cin,)
    """
    N, Cin, L = x_ncl.shape
    Ch = w1_pt.shape[0]

    # Tiny host-side weight re-layouts (replace the big activation transposes).
    w1_taps = jnp.transpose(w1_pt, (2, 0, 1))        # (3, Ch, Cin)
    b1_col = b1.reshape(Ch, 1)
    w2_mat = w2_pt[:, :, 0]                          # (Cin, Ch)
    b2_col = b2.reshape(Cin, 1)

    return pl.pallas_call(
        resblock_kernel,
        out_shape=jax.ShapeDtypeStruct((N, Cin, L), x_ncl.dtype),
        grid_spec=pltpu.PrefetchScalarGridSpec(
            num_scalar_prefetch=0,
            grid=(N,),
            in_specs=[
                pl.BlockSpec((1, Cin, L), lambda n: (n, 0, 0)),
                pl.BlockSpec((3, Ch, Cin), lambda n: (0, 0, 0)),
                pl.BlockSpec((Ch, 1), lambda n: (0, 0)),
                pl.BlockSpec((Cin, Ch), lambda n: (0, 0)),
                pl.BlockSpec((Cin, 1), lambda n: (0, 0)),
            ],
            out_specs=pl.BlockSpec((1, Cin, L), lambda n: (n, 0, 0)),
        ),
        compiler_params=pltpu.CompilerParams(dimension_semantics=("parallel",)),
    )(x_ncl, w1_taps, b1_col, w2_mat, b2_col)


def resblock_reference(x_ncl, w1_pt, b1, w2_pt, b2):
    """Pure-JAX reference using lax conv (matches PyTorch Conv1d semantics)."""
    h = jnp.maximum(x_ncl, 0.0)
    y1 = jax.lax.conv_general_dilated(
        h, w1_pt, window_strides=(1,), padding=((1, 1),),
        dimension_numbers=("NCH", "OIH", "NCH")) + b1[None, :, None]
    h2 = jnp.maximum(y1, 0.0)
    y2 = jax.lax.conv_general_dilated(
        h2, w2_pt, window_strides=(1,), padding=((0, 0),),
        dimension_numbers=("NCH", "OIH", "NCH")) + b2[None, :, None]
    return y2 + x_ncl


if __name__ == "__main__":
    # Small shapes consistent with the module: batch=2, in_channel=8, channel=16, seq=16.
    N, Cin, Ch, L = 2, 8, 16, 16

    key = jax.random.PRNGKey(0)
    kx, kw1, kb1, kw2, kb2 = jax.random.split(key, 5)

    x = jax.random.normal(kx, (N, Cin, L), dtype=jnp.float32)

    # Deterministic synthetic parameters in PyTorch Conv1d layout:
    #   conv1: (Ch, Cin, 3), conv2: (Cin, Ch, 1).
    w1 = jax.random.normal(kw1, (Ch, Cin, 3), dtype=jnp.float32) * (1.0 / jnp.sqrt(3.0 * Cin))
    b1 = jax.random.normal(kb1, (Ch,), dtype=jnp.float32) * 0.1
    w2 = jax.random.normal(kw2, (Cin, Ch, 1), dtype=jnp.float32) * (1.0 / jnp.sqrt(float(Ch)))
    b2 = jax.random.normal(kb2, (Cin,), dtype=jnp.float32) * 0.1

    out = jax.block_until_ready(resblock_forward(x, w1, b1, w2, b2))
    ref = jax.block_until_ready(resblock_reference(x, w1, b1, w2, b2))

    assert out.shape == (N, Cin, L), out.shape
    err = float(jnp.max(jnp.abs(out - ref)))
    assert jnp.allclose(out, ref, rtol=1e-3, atol=1e-3), err

    print("KERNEL_OK")
</pallas_src>

<mosaic_0001>
module attributes {stable_mosaic.version = 11 : i64} {
  func.func @resblock_kernel(%arg0: i32, %arg1: memref<1x8x16xf32, #tpu.memory_space<vmem>>, %arg2: memref<3x16x8xf32, #tpu.memory_space<vmem>>, %arg3: memref<16x1xf32, #tpu.memory_space<vmem>>, %arg4: memref<8x16xf32, #tpu.memory_space<vmem>>, %arg5: memref<8x1xf32, #tpu.memory_space<vmem>>, %arg6: memref<1x8x16xf32, #tpu.memory_space<vmem>>) attributes {dimension_semantics = [#tpu.dimension_semantics<parallel>], iteration_bounds = array<i64: 2>, scalar_prefetch = 0 : i64, scratch_operands = 0 : i64, tpu.core_type = #tpu.core_type<tc>, window_params = [{transform_indices = @transform_0, window_bounds = array<i64: 1, 8, 16>}, {pipeline_mode = #tpu.pipeline_mode<synchronous>, transform_indices = @transform_1, window_bounds = array<i64: 3, 16, 8>}, {pipeline_mode = #tpu.pipeline_mode<synchronous>, transform_indices = @transform_2, window_bounds = array<i64: 16, 1>}, {pipeline_mode = #tpu.pipeline_mode<synchronous>, transform_indices = @transform_3, window_bounds = array<i64: 8, 16>}, {pipeline_mode = #tpu.pipeline_mode<synchronous>, transform_indices = @transform_4, window_bounds = array<i64: 8, 1>}, {transform_indices = @transform_5, window_bounds = array<i64: 1, 8, 16>}]} {
    %c0 = arith.constant 0 : index
    %c0_0 = arith.constant 0 : index
    %c0_1 = arith.constant 0 : index
    %0 = vector.load %arg1[%c0, %c0_0, %c0_1] : memref<1x8x16xf32, #tpu.memory_space<vmem>>, vector<1x8x16xf32>
    %1 = vector.shape_cast %0 : vector<1x8x16xf32> to vector<8x16xf32>
    %cst = arith.constant 0.000000e+00 : f32
    %2 = vector.broadcast %cst : f32 to vector<8x16xf32>
    %3 = arith.maximumf %1, %2 : vector<8x16xf32>
    %4 = tpu.iota {dimensions = array<i32: 1>} : vector<8x16xi32>
    %c0_i32 = arith.constant 0 : i32
    %5 = vector.broadcast %c0_i32 : i32 to vector<8x16xi32>
    %6 = arith.cmpi eq, %4, %5 : vector<8x16xi32>
    %c1_i32 = arith.constant 1 : i32
    %7 = tpu.dynamic_rotate %3 by %c1_i32 dim 1 : vector<8x16xf32>, i32 -> vector<8x16xf32>
    %cst_2 = arith.constant 0.000000e+00 : f32
    %8 = vector.broadcast %cst_2 : f32 to vector<8x16xf32>
    %9 = arith.select %6, %8, %7 : vector<8x16xi1>, vector<8x16xf32>
    %c15_i32 = arith.constant 15 : i32
    %10 = vector.broadcast %c15_i32 : i32 to vector<8x16xi32>
    %11 = arith.cmpi eq, %4, %10 : vector<8x16xi32>
    %c15_i32_3 = arith.constant 15 : i32
    %12 = tpu.dynamic_rotate %3 by %c15_i32_3 dim 1 : vector<8x16xf32>, i32 -> vector<8x16xf32>
    %cst_4 = arith.constant 0.000000e+00 : f32
    %13 = vector.broadcast %cst_4 : f32 to vector<8x16xf32>
    %14 = arith.select %11, %13, %12 : vector<8x16xi1>, vector<8x16xf32>
    %c0_5 = arith.constant 0 : index
    %c0_6 = arith.constant 0 : index
    %c0_7 = arith.constant 0 : index
    %15 = vector.load %arg2[%c0_5, %c0_6, %c0_7] : memref<3x16x8xf32, #tpu.memory_space<vmem>>, vector<1x16x8xf32>
    %16 = vector.shape_cast %15 : vector<1x16x8xf32> to vector<16x8xf32>
    %cst_8 = arith.constant dense<0.000000e+00> : vector<16x16xf32>
    %17 = tpu.matmul %16, %9, %cst_8 {dimension_numbers = #tpu.dot_dimension_numbers<[1], [0], [0], [1], [0, 0, 1, 1], [], []>} : vector<16x8xf32>, vector<8x16xf32>, vector<16x16xf32> -> vector<16x16xf32>
    %c1 = arith.constant 1 : index
    %c0_9 = arith.constant 0 : index
    %c0_10 = arith.constant 0 : index
    %18 = vector.load %arg2[%c1, %c0_9, %c0_10] : memref<3x16x8xf32, #tpu.memory_space<vmem>>, vector<1x16x8xf32>
    %19 = vector.shape_cast %18 : vector<1x16x8xf32> to vector<16x8xf32>
    %cst_11 = arith.constant dense<0.000000e+00> : vector<16x16xf32>
    %20 = tpu.matmul %19, %3, %cst_11 {dimension_numbers = #tpu.dot_dimension_numbers<[1], [0], [0], [1], [0, 0, 1, 1], [], []>} : vector<16x8xf32>, vector<8x16xf32>, vector<16x16xf32> -> vector<16x16xf32>
    %21 = arith.addf %17, %20 : vector<16x16xf32>
    %c2 = arith.constant 2 : index
    %c0_12 = arith.constant 0 : index
    %c0_13 = arith.constant 0 : index
    %22 = vector.load %arg2[%c2, %c0_12, %c0_13] : memref<3x16x8xf32, #tpu.memory_space<vmem>>, vector<1x16x8xf32>
    %23 = vector.shape_cast %22 : vector<1x16x8xf32> to vector<16x8xf32>
    %cst_14 = arith.constant dense<0.000000e+00> : vector<16x16xf32>
    %24 = tpu.matmul %23, %14, %cst_14 {dimension_numbers = #tpu.dot_dimension_numbers<[1], [0], [0], [1], [0, 0, 1, 1], [], []>} : vector<16x8xf32>, vector<8x16xf32>, vector<16x16xf32> -> vector<16x16xf32>
    %25 = arith.addf %21, %24 : vector<16x16xf32>
    %c0_15 = arith.constant 0 : index
    %c0_16 = arith.constant 0 : index
    %26 = vector.load %arg3[%c0_15, %c0_16] : memref<16x1xf32, #tpu.memory_space<vmem>>, vector<16x1xf32>
    %27 = vector.broadcast %26 : vector<16x1xf32> to vector<16x16xf32>
    %28 = arith.addf %25, %27 : vector<16x16xf32>
    %cst_17 = arith.constant 0.000000e+00 : f32
    %29 = vector.broadcast %cst_17 : f32 to vector<16x16xf32>
    %30 = arith.maximumf %28, %29 : vector<16x16xf32>
    %c0_18 = arith.constant 0 : index
    %c0_19 = arith.constant 0 : index
    %31 = vector.load %arg4[%c0_18, %c0_19] : memref<8x16xf32, #tpu.memory_space<vmem>>, vector<8x16xf32>
    %cst_20 = arith.constant dense<0.000000e+00> : vector<8x16xf32>
    %32 = tpu.matmul %31, %30, %cst_20 {dimension_numbers = #tpu.dot_dimension_numbers<[1], [0], [0], [1], [0, 0, 1, 1], [], []>} : vector<8x16xf32>, vector<16x16xf32>, vector<8x16xf32> -> vector<8x16xf32>
    %c0_21 = arith.constant 0 : index
    %c0_22 = arith.constant 0 : index
    %33 = vector.load %arg5[%c0_21, %c0_22] : memref<8x1xf32, #tpu.memory_space<vmem>>, vector<8x1xf32>
    %34 = vector.broadcast %33 : vector<8x1xf32> to vector<8x16xf32>
    %35 = arith.addf %32, %34 : vector<8x16xf32>
    %36 = arith.addf %35, %1 : vector<8x16xf32>
    %c0_23 = arith.constant 0 : index
    %c0_24 = arith.constant 0 : index
    %c0_25 = arith.constant 0 : index
    %37 = vector.load %arg6[%c0_23, %c0_24, %c0_25] : memref<1x8x16xf32, #tpu.memory_space<vmem>>, vector<1x8x16xf32>
    %38 = vector.shape_cast %37 : vector<1x8x16xf32> to vector<8x16xf32>
    %39 = vector.shape_cast %36 : vector<8x16xf32> to vector<1x8x16xf32>
    tpu.vector_store %arg6[%c0_23, %c0_24, %c0_25], %39 {strides = array<i32>} : memref<1x8x16xf32, #tpu.memory_space<vmem>>, vector<1x8x16xf32>,
    return
  }
  func.func @transform_0(%arg0: i32) -> (i32, i32, i32) {
    %c0_i32 = arith.constant 0 : i32
    %c0_i32_0 = arith.constant 0 : i32
    %c0_i32_1 = arith.constant 0 : i32
    return %arg0, %c0_i32, %c0_i32_0 : i32, i32, i32
  }
  func.func @transform_1(%arg0: i32) -> (i32, i32, i32) {
    %c0_i32 = arith.constant 0 : i32
    %c0_i32_0 = arith.constant 0 : i32
    %c0_i32_1 = arith.constant 0 : i32
    %c0_i32_2 = arith.constant 0 : i32
    return %c0_i32, %c0_i32_0, %c0_i32_1 : i32, i32, i32
  }
  func.func @transform_2(%arg0: i32) -> (i32, i32) {
    %c0_i32 = arith.constant 0 : i32
    %c0_i32_0 = arith.constant 0 : i32
    %c0_i32_1 = arith.constant 0 : i32
    return %c0_i32, %c0_i32_0 : i32, i32
  }
  func.func @transform_3(%arg0: i32) -> (i32, i32) {
    %c0_i32 = arith.constant 0 : i32
    %c0_i32_0 = arith.constant 0 : i32
    %c0_i32_1 = arith.constant 0 : i32
    return %c0_i32, %c0_i32_0 : i32, i32
  }
  func.func @transform_4(%arg0: i32) -> (i32, i32) {
    %c0_i32 = arith.constant 0 : i32
    %c0_i32_0 = arith.constant 0 : i32
    %c0_i32_1 = arith.constant 0 : i32
    return %c0_i32, %c0_i32_0 : i32, i32
  }
  func.func @transform_5(%arg0: i32) -> (i32, i32, i32) {
    %c0_i32 = arith.constant 0 : i32
    %c0_i32_0 = arith.constant 0 : i32
    %c0_i32_1 = arith.constant 0 : i32
    return %arg0, %c0_i32, %c0_i32_0 : i32, i32, i32
  }
}

</mosaic_0001>

<bundles_post_ra>
// kernel: tpu_custom_call.1
= control target key start
LH: loop header
LB: loop body
LE: loop exit
PB: predicated region body
PF: predicated region fallthrough
CT: control target
= control target key end

     0   :  { %10 = vsyncpa [#allocation3], 0  ;;  %s761_s0 = inlined_call_operand.vmem [shape: f32[2,8,16], index: 0, kind: input, shape index: {}]   ;;  %s762_s1 = inlined_call_operand.vmem [shape: f32[3,16,8], index: 1, kind: input, shape index: {}]   ;;  %s763_s2 = inlined_call_operand.vmem [shape: f32[16,1], index: 2, kind: input, shape index: {}]   ;;  %s764_s3 = inlined_call_operand.vmem [shape: f32[8,16], index: 3, kind: input, shape index: {}]   ;;  %s765_s4 = inlined_call_operand.vmem [shape: f32[8,1], index: 4, kind: input, shape index: {}]   ;;  %s766_s5 = inlined_call_operand.hbm [shape: f32[2,8,16], index: 5, kind: output, shape index: {}]  }
   0x1   :  { %12 = vsyncpa [#allocation3 + $0x1], 0  ;;  %s634_s18 = smov 0   ;;  %s636_s19 = smov 0  }
   0x2   :  { %s638_s20 = smov 0   ;;  %s640_s21 = smov 0  }
   0x3 LB: > { %s655_s22 = sadd.s32 4294967295, %s598_s21   ;;  %s464_s23 = sadd.s32 4294967294, %s598_s21   ;;  %s598_s21 = sphi %s640_s21, %s772_s21   ;;  %s594_s20 = sphi %s638_s20, %s771_s20   ;;  %s590_s19 = sphi %s636_s19, %s770_s19   ;;  %s586_s18 = sphi %s634_s18, %s769_s18  }
   0x4   : > { %s659_s24 = sadd.s32 1, %s598_s21   ;;  %s135_s25 = sadd.s32 1, %s594_s20 }
   0x5   : > { %s132_s26 = ssub.s32 %s598_s21, %s659_s24  ;;  %p145_p0 = scmp.ne.s32.totalorder %s594_s20, %s590_s19 }
   0x6   : > { %p133_p1 = scmp.eq.s32.totalorder %s132_s26, 0  ;;  %p146_p2 = scmp.eq.s32.totalorder %s655_s22, 1 }
   0x7   : > { %p151_p3 = scmp.ne.s32.totalorder %s590_s19, %s586_s18  ;;  %p152_p4 = scmp.eq.s32.totalorder %s464_s23, 1 }
   0x8   : > { %s670_s27 = scalar_select %p133_p1, %s594_s20, %s135_s25  }
   0x9   : > { %p672_p5 = por %p146_p2, %p145_p0  ;;  %p676_p6 = por %p152_p4, %p151_p3 }
   0xa   : > { %p467_p7 = scmp.ge.s32.totalorder %s598_s21, 1  ;;  %p189_p8 = scmp.lt.s32.totalorder %s598_s21, 3 }
   0xc   : > { %p190_p9 = pnand %p467_p7, %p189_p8 }
   0xd   : > { %p216_p10 = scmp.lt.s32.totalorder (!%p190_p9), %s655_s22, 1  ;;  %s600_s10 = smov (!%p190_p9), 16  }
   0xe   : > { %193 = sbr.rel (%p190_p9) target bundleno = 666 (0x29a), region = 40  ;;  %s601_s11 = smov (!%p190_p9), 127  }
   0xf   : > { %s602_s12 = smov (!%p190_p9), 113   ;;  %s213_s17 = sand.u32 (!%p190_p9), 1, %s590_s19  }
  0x10   : > { %s468_s23 = sshll.u32 (!%p190_p9), %s213_s17, 3  ;;  %s486_s25 = sshll.u32 (!%p190_p9), %s655_s22, 3 }
  0x11   : > { %s215_s7 = scalar_lea.vmem (!%p190_p9), [#allocation2], %s468_s23  ;;  %s556_s14 = scalar_lea.hbm (!%p190_p9), %s766_s5, 16 }
  0x12   : > { %s402_s8 = sshll.u32 (!%p190_p9), %s215_s7, 4  ;;  %s403_s8 = int_to_ptr.vmem [resolvable:$true] %s402_s8 }
  0x13   : > { %s217_s30 = scalar_select %p216_p10, %s655_s22, 1  ;;  %vm225_vm0 = vcmask 1047680   ;;  %vm247_vm1 = vcmask 64512   ;;  %v470_v6 = vld [vmem:[%s762_s1 + $0x10] sm:$0xff]  ;;  %v471_v7 = vld [vmem:[%s762_s1 + $0x18] sm:$0xff]  ;;  %v341_v8 = vld [vmem:[%s763_s2 + $0x8] sm:$0xff]  ;;  %v222_v10 = vlaneseq }
  0x14   : > { %v603_v9 = vmov 0   ;;  %v340_v11 = vld [vmem:[%s763_s2] sm:$0xff]  ;;  %v479_v16 = vld [vmem:[%s762_s1 + $0x28] sm:$0xff]  ;;  %vm363_vm4 = vcmask 130048  }
  0x15   : > { %s469_s6 = sshll.u32 %s217_s30, 3  ;;  %534 = vset.pattern.permute.xlu2 %v603_v9  ;;  %535 = vset.pattern.permute.xlu0 %v603_v9  ;;  %v223_v12 = vand.u32 127, %v222_v10  ;;  %v478_v13 = vld [vmem:[%s762_s1 + $0x20] sm:$0xff]  ;;  %v243_v18 = vld [vmem:[%s762_s1 + $0x8] sm:$0xff] }
  0x16   : > { %s219_s9 = scalar_lea.vmem %s761_s0, %s469_s6  ;;  %349 = vperm.xlu2 %534, %v341_v8   ;;  %v242_v15 = vld [vmem:[%s762_s1] sm:$0xff]  ;;  %s400_s6 = scalar_lea.hbm %s766_s5, %s486_s25 }
  0x17   : > { %v687_v0 = vld [vmem:[%s219_s9] sm:$0xff]  ;;  %vm490_vm2 = vcmp.ne.s32.totalorder %v223_v12, 15  ;;  %vm489_vm3 = vcmp.ne.s32.totalorder %v223_v12, 0  ;;  %s404_s9 = sshll.u32 %s400_s6, 4  ;;  %s405_s9 = int_to_ptr.hbm [resolvable:$true] %s404_s9 }
  0x18   : > { %v221_v1 = vmax.f32 %v687_v0, 0.0  ;;  %v357_v19 = vld [vmem:[%s765_s4] sm:$0xff] }
  0x19   : > { %v356_v36 = vld [vmem:[%s764_s3] sm:$0xff] }
  0x1a   : > { %226 = vrot.lane.b32.xlu0 %v221_v1, %s600_s10  ;;  %269 = vmatpush.msra.mxu0 %v221_v1 }
  0x1b   : > { %472 = vmatmul.msk.f32.vlgmr.msra.gmra.mxu0 %vm247_vm1, %v470_v6 }
  0x1e   : > { %344 = vperm.xlu2 %534, %v340_v11  }
  0x23   : > { %473 = vmatmul.msk.f32.gmra.mxu0 %vm247_vm1, %v471_v7 }
  0x70   : > { %v350_v22 = vpop.permute.xlu2 %349 }
  0x78   : > { %v345_v30 = vpop.permute.xlu2 %344 }
  0x8c   : > { %v227_v2 = vpop.permute.xlu0 %226 }
  0x8d   : > { %v228_v3 = vsel %vm225_vm0, %v227_v2, %v221_v1 }
  0x8e   : > { %229 = vrot.lane.b32.xlu0 %v228_v3, %s600_s10  ;;  %s390_s10 = scalar_lea.sflag [#allocation3], %s213_s17 }
  0x96   : > { %360 = vperm.xlu0 %535, %v357_v19  }
  0x98   : > { %v271_v20 = vpop.f32.mrf.mxu0 }
  0xa0   : > { %v274_v25 = vpop.f32.mrf.mxu0 }
 0x100   : > { %v230_v4 = vpop.permute.xlu0 %229 }
 0x101   : > { %v231_v5 = vsel %vm225_vm0, %v230_v4, %v221_v1 }
 0x102   : > { %238 = vrot.lane.b32.xlu1 %v231_v5, %s601_s11  ;;  %s550_s11 = sshra.s32 %s405_s9, 4  ;;  %s551_s11 = int_to_ptr.hbm [resolvable:$true] %s550_s11 }
 0x103   : > { %s552_s22 = scalar_lea.hbm %s551_s11, 8  ;;  %p557_p0 = scmp.lt.s32.totalorder %s551_s11, %s766_s5 }
 0x104   : > { %p553_p11 = scmp.ne.s32.totalorder %s551_s11, %s552_s22  ;;  %p558_p1 = scmp.lt.s32.totalorder %s556_s14, %s552_s22 }
 0x106   : > { %p554_p12 = pnand %p553_p11, %p672_p5  ;;  %p559_p2 = por %p558_p1, %p557_p0 }
 0x108   : > { %v361_v37 = vpop.permute.xlu0 %360  ;;  %p555_p13 = pneg %p554_p12 }
 0x10a   : > { %233 = vrot.lane.b32.xlu1 %v231_v5, %s602_s12  ;;  %p560_p3 = pnand %p559_p2, %p555_p13 }
 0x174   : > { %v239_v14 = vpop.permute.xlu1 %238 }
 0x175   : > { %481 = vmatpush.msk.msra.mxu2 %vm490_vm2, %v239_v14 }
 0x176   : > { %482 = vmatmul.msk.f32.vlgmr.msra.gmra.mxu2 %vm247_vm1, %v478_v13 }
 0x17c   : > { %v234_v17 = vpop.permute.xlu1 %233 }
 0x17d   : > { %475 = vmatpush.msk.msra.mxu1 %vm489_vm3, %v234_v17 }
 0x17e   : > { %476 = vmatmul.msk.f32.vlgmr.msra.gmra.mxu1 %vm247_vm1, %v242_v15  ;;  %483 = vmatmul.msk.f32.gmra.mxu2 %vm247_vm1, %v479_v16 }
 0x186   : > { %477 = vmatmul.msk.f32.gmra.mxu1 %vm247_vm1, %v243_v18 }
 0x1f9   : > { %v332_v21 = vpop.f32.mrf.mxu2 }
 0x1fb   : > { %v300_v23 = vpop.f32.mrf.mxu1 }
 0x1fc   : > { %v301_v24 = vadd.f32 %v300_v23, %v271_v20 }
 0x1fe   : > { %v338_v28 = vadd.f32 %v332_v21, %v301_v24 }
 0x200   : > { %v352_v32 = vadd.f32 %v345_v30, %v338_v28 }
 0x201   : > { %v335_v27 = vpop.f32.mrf.mxu2 }
 0x202   : > { %v354_v35 = vmax.f32 %v352_v32, 0.0 }
 0x203   : > { %v303_v26 = vpop.f32.mrf.mxu1 }
 0x204   : > { %v304_v29 = vadd.f32 %v303_v26, %v274_v25 }
 0x206   : > { %v339_v31 = vadd.f32 %v335_v27, %v304_v29 }
 0x208   : > { %v353_v33 = vadd.f32 %v350_v22, %v339_v31 }
 0x20a   : > { %v355_v34 = vmax.f32 %v353_v33, 0.0 }
 0x20c   : > { %381 = vmatpush.msra.mxu3 %v355_v34 }
 0x20e   : > { %382 = vmatpush.msra.mxu3 %v354_v35 }
 0x20f   : > { %484 = vmatmul.msk.f32.vlgmr.msra.gmra.mxu3 %vm363_vm4, %v356_v36 }
 0x292   : > { %v384_v38 = vpop.f32.mrf.mxu3 }
 0x293   : > { %v385_v39 = vadd.f32 %v384_v38, %v361_v37 }
 0x295   : > { %v387_v40 = vadd.f32 %v385_v39, %v687_v0 }
 0x297   : > { %388 = vst.msk [vmem:[%s215_s7] sm:$0xff] %vm363_vm4, %v387_v40 }
 0x298   : > { %563 = shalt.err (!%p560_p3)
}
 0x299   : > { %491 = dma.vmem_to_hbm [thread:$0]  (%p672_p5), %s403_s8, 128, %s405_s9, %s390_s10  }
 0x29a PF: > { %p497_p4 = scmp.ge.s32.totalorder %s598_s21, 2  ;;  %s416_s17 = sand.u32 1, %s586_s18  }
 0x29b   : > { %s417_s23 = scalar_lea.sflag [#allocation3], %s416_s17 }
 0x29c   : > { %p494_p7 = pnand %p497_p4, %p676_p6 }
 0x29e   : > { %p495_p8 = pneg %p494_p7 }
 0x2a0   : > { %581 = dma.done.wait (%p495_p8), %s417_s23, 128  }
 0x2a1   : > { %583 = vsyncadd (%p495_p8), %s417_s23, 4294967168  ;;  %p15_p9 = scmp.ge.s32.totalorder %s659_s24, 4   ;;  %s769_s18 = smov %s590_s19 }
 0x2a2   : > { %s770_s19 = smov %s594_s20  ;;  %s771_s20 = smov %s670_s27 }
 0x2a3   : > { %s772_s21 = smov %s659_s24  ;;  %17 = sbr.rel (!%p15_p9) target bundleno = 3 (0x3), region = 77 }
 0x2a8   :  { %423 = vsyncpa [#allocation3], 1 }
 0x2a9   :  { %425 = vsyncpa [#allocation3 + $0x1], 1 }

</bundles_post_ra>
